<compile_context>
chip_gen: v7x
topology: tpu7x:2x2x1
jax: 0.10.0
libtpu: 0.0.40
codegen_flags: <defaults>
</compile_context>

<pallas_src>
import math
import functools

import jax
import jax.numpy as jnp
from jax.experimental import pallas as pl
from jax.experimental.pallas import tpu as pltpu


def _gelu_exact(x):
    # Matches HF ACT2FN["gelu"] / torch.nn.GELU default (erf-based, exact).
    return 0.5 * x * (1.0 + jax.lax.erf(x * 0.7071067811865476))


def _round_up(a, b):
    return (a + b - 1) // b * b


# ----------------------------------------------------------------------------
# Kernel bodies
# ----------------------------------------------------------------------------
def _mlp_body(x_ref, w1_ref, b1_ref, w2_ref, b2_ref, o_ref, acc_ref):
    # x_ref:  (tm, D)    row tile of flattened hidden_states (resident across I axis)
    # w1_ref: (D,  ti)   in_proj weight chunk
    # b1_ref: (1,  ti)   in_proj bias chunk
    # w2_ref: (ti, D)    out_proj weight chunk
    # b2_ref: (1,  D)    out_proj bias (full)
    # o_ref:  (tm, D)    output tile
    # acc_ref:(tm, D)    f32 accumulator (either a VMEM scratch or o_ref itself)
    j = pl.program_id(1)

    # First projection for this I-chunk, GELU in f32, then the second projection.
    h = jnp.dot(x_ref[...].astype(w1_ref.dtype), w1_ref[...],
                preferred_element_type=jnp.float32)
    h = _gelu_exact(h + b1_ref[...].astype(jnp.float32))
    contrib = jnp.dot(h.astype(w2_ref.dtype), w2_ref[...],
                      preferred_element_type=jnp.float32)

    @pl.when(j == 0)
    def _():
        # Assign instead of zero-init + add: saves one tm x D f32 store + load.
        acc_ref[...] = contrib

    @pl.when(j != 0)
    def _():
        # Bare += on the dot result so v7x can accumulate in place in the MRB.
        acc_ref[...] += contrib

    @pl.when(j == pl.num_programs(1) - 1)
    def _():
        # Epilogue: bias add + final cast once per output tile.
        # TODO(synk): resid_dropout is identity in eval mode; training-mode dropout not implemented.
        o_ref[...] = (acc_ref[...] + b2_ref[...].astype(jnp.float32)).astype(o_ref.dtype)


def mlp_kernel_scratch(x_ref, w1_ref, b1_ref, w2_ref, b2_ref, o_ref, acc_ref):
    _mlp_body(x_ref, w1_ref, b1_ref, w2_ref, b2_ref, o_ref, acc_ref)


def mlp_kernel_inplace(x_ref, w1_ref, b1_ref, w2_ref, b2_ref, o_ref):
    # f32 output: accumulate directly in the resident output block, no scratch.
    _mlp_body(x_ref, w1_ref, b1_ref, w2_ref, b2_ref, o_ref, o_ref)


# ----------------------------------------------------------------------------
# Generation- / dtype-aware configuration
# ----------------------------------------------------------------------------
def _tpu_generation_and_vmem():
    kind = ""
    try:
        kind = jax.devices()[0].device_kind.lower()
    except Exception:
        pass
    if "v6" in kind:
        gen = "v6e"
    elif "v7" in kind or "7x" in kind:
        gen = "v7x"
    elif "v5" in kind:
        gen = "v5e"
    else:
        gen = "unknown"

    vmem_cap = None
    try:
        info = pltpu.get_tpu_info()
        cap = getattr(info, "vmem_capacity_bytes", None)
        if cap:
            vmem_cap = int(cap)
    except Exception:
        vmem_cap = None
    if vmem_cap is None:
        vmem_cap = {"v5e": 128, "v6e": 128, "v7x": 64}.get(gen, 64) * 1024 * 1024
    return gen, vmem_cap


def _select_config(M, D, I, x_dtype, w_dtype, out_dtype):
    """Pick (tm, ti, vmem_limit_bytes) for this generation / dtype / shape."""
    gen, vmem_cap = _tpu_generation_and_vmem()
    x_sz = jnp.dtype(x_dtype).itemsize
    w_sz = jnp.dtype(w_dtype).itemsize
    o_sz = jnp.dtype(out_dtype).itemsize
    out_is_f32 = jnp.dtype(out_dtype) == jnp.dtype(jnp.float32)
    row_align = 8 if x_sz >= 4 else 16

    if gen == "v6e":
        # Weight-streaming roofline: bf16 needs tm >~ 650 to be MXU-bound.
        tm_target, ti_prefs = 1024, (1024, 512, 256)
    elif gen == "v5e":
        tm_target, ti_prefs = 512, (512, 256)
    elif gen == "v7x":
        # ~3.2 TB/s HBM per TC -> tm ~ 512 already compute-bound; 64 MiB VMEM.
        tm_target, ti_prefs = 512, (512, 256)
    else:
        tm_target, ti_prefs = 512, (512, 256)

    budget = int(vmem_cap * 0.8)  # headroom for Mosaic internal scratch, etc.

    def footprint(tm, ti):
        return (2 * tm * D * x_sz            # x tile (counted double-buffered, conservative)
                + 2 * D * ti * w_sz          # w1 chunk (double-buffered)
                + 2 * ti * D * w_sz          # w2 chunk (double-buffered)
                + 2 * (ti + D) * w_sz        # biases
                + 2 * tm * D * o_sz          # output tile
                + (0 if out_is_f32 else tm * D * 4))  # f32 scratch accumulator

    tm_eff = _round_up(min(tm_target, _round_up(M, row_align)), row_align)

    ti_prefs = tuple(min(t, _round_up(I, 128)) for t in ti_prefs)
    ti_eff = None
    for t in ti_prefs:
        if footprint(tm_eff, t) <= budget:
            ti_eff = t
            break
    if ti_eff is None:
        ti_eff = ti_prefs[-1]
        while footprint(tm_eff, ti_eff) > budget and tm_eff > row_align:
            tm_eff = max(row_align, _round_up(tm_eff // 2, row_align))

    if gen == "v7x" and M > 2 * row_align:
        # Two TensorCores share the "parallel" M axis: keep the tile count even.
        n_tiles = -(-M // tm_eff)
        if n_tiles % 2 == 1:
            n_tiles += 1
            tm_eff = max(row_align, _round_up(-(-M // n_tiles), row_align))

    vmem_limit = max(32 * 1024 * 1024,
                     min(int(vmem_cap) - 8 * 1024 * 1024, 120 * 1024 * 1024))
    return int(tm_eff), int(ti_eff), int(vmem_limit)


def _x_block_spec(block_shape, index_map):
    # x's index map is constant along the reduction axis -> single-buffer it to
    # reclaim tm*D bytes of VMEM. Fall back if this JAX build rejects it.
    try:
        return pl.BlockSpec(block_shape, index_map, pipeline_mode=pl.Buffered(1))
    except Exception:
        return pl.BlockSpec(block_shape, index_map)


# ----------------------------------------------------------------------------
# Forward wrapper
# ----------------------------------------------------------------------------
@functools.partial(jax.jit, static_argnames=("tm", "ti", "mxu_dtype"))
def mlp_forward(hidden_states, w1, b1, w2, b2, *, tm=None, ti=None, mxu_dtype=None):
    """hidden_states: [..., D]; w1: [D, I]; b1: [I]; w2: [I, D]; b2: [D].

    mxu_dtype: optional (e.g. jnp.bfloat16) — cast x/w1/w2 for the MXU while
    keeping f32 accumulation. Default None keeps exact input-dtype numerics.
    """
    orig_shape = hidden_states.shape
    D = orig_shape[-1]
    I = w1.shape[1]
    out_dtype = hidden_states.dtype

    x = hidden_states.reshape(-1, D)
    if mxu_dtype is not None:
        x = x.astype(mxu_dtype)
        w1 = w1.astype(mxu_dtype)
        w2 = w2.astype(mxu_dtype)
    M = x.shape[0]

    tm_sel, ti_sel, vmem_limit = _select_config(M, D, I, x.dtype, w1.dtype, out_dtype)
    row_align = 8 if jnp.dtype(x.dtype).itemsize >= 4 else 16
    tm_eff = tm_sel if tm is None else _round_up(min(tm, _round_up(M, row_align)), row_align)
    ti_eff = ti_sel if ti is None else _round_up(min(ti, _round_up(I, 128)), 128)

    # Pad rows up to a tile multiple (padded rows compute garbage, sliced off).
    M_pad = _round_up(M, tm_eff)
    if M_pad != M:
        x = jnp.pad(x, ((0, M_pad - M), (0, 0)))

    # Pad the intermediate dim with zeros: GELU(x @ 0 + 0) == 0, and the padded
    # w2 rows are zero too, so the result is exact and VMEM stays bounded.
    I_pad = _round_up(I, ti_eff)
    if I_pad != I:
        w1 = jnp.pad(w1, ((0, 0), (0, I_pad - I)))
        b1 = jnp.pad(b1, ((0, I_pad - I),))
        w2 = jnp.pad(w2, ((0, I_pad - I), (0, 0)))

    b1_2d = b1.reshape(1, I_pad)
    b2_2d = b2.reshape(1, D)

    grid = (M_pad // tm_eff, I_pad // ti_eff)

    out_is_f32 = jnp.dtype(out_dtype) == jnp.dtype(jnp.float32)
    if out_is_f32:
        kernel = mlp_kernel_inplace
        scratch_shapes = ()
    else:
        kernel = mlp_kernel_scratch
        scratch_shapes = (pltpu.VMEM((tm_eff, D), jnp.float32),)

    # Weights are re-streamed once per M tile -> count them grid[0] times.
    x_sz = jnp.dtype(x.dtype).itemsize
    w_sz = jnp.dtype(w1.dtype).itemsize
    o_sz = jnp.dtype(out_dtype).itemsize
    flops = 4 * M_pad * I_pad * D  # two matmuls, 2*M*I*D each
    bytes_accessed = (
        M_pad * D * x_sz
        + grid[0] * (w1.size + w2.size + b1_2d.size + b2_2d.size) * w_sz
        + M_pad * D * o_sz
    )

    out = pl.pallas_call(
        kernel,
        out_shape=jax.ShapeDtypeStruct((M_pad, D), out_dtype),
        grid_spec=pltpu.PrefetchScalarGridSpec(
            num_scalar_prefetch=0,
            grid=grid,
            in_specs=[
                _x_block_spec((tm_eff, D), lambda i, j: (i, 0)),      # x row tile
                pl.BlockSpec((D, ti_eff), lambda i, j: (0, j)),       # w1 chunk
                pl.BlockSpec((1, ti_eff), lambda i, j: (0, j)),       # b1 chunk
                pl.BlockSpec((ti_eff, D), lambda i, j: (j, 0)),       # w2 chunk
                pl.BlockSpec((1, D), lambda i, j: (0, 0)),            # b2 (full)
            ],
            out_specs=pl.BlockSpec((tm_eff, D), lambda i, j: (i, 0)),
            scratch_shapes=scratch_shapes,
        ),
        compiler_params=pltpu.CompilerParams(
            dimension_semantics=("parallel", "arbitrary"),
            vmem_limit_bytes=vmem_limit,
        ),
        cost_estimate=pl.CostEstimate(
            flops=flops,
            transcendentals=M_pad * I_pad,
            bytes_accessed=bytes_accessed,
        ),
    )(x, w1, b1_2d, w2, b2_2d)

    if M_pad != M:
        out = out[:M]
    return out.reshape(orig_shape)


def init_mlp_params(key, embed_dim, inner_dim, dtype=jnp.float32):
    """Deterministic init mimicking nn.Linear (uniform(-1/sqrt(fan_in), 1/sqrt(fan_in)))."""
    k1, k2, k3, k4 = jax.random.split(key, 4)
    lim1 = 1.0 / math.sqrt(embed_dim)
    lim2 = 1.0 / math.sqrt(inner_dim)
    # stored as [in_features, out_features] (transpose of torch layout)
    w1 = jax.random.uniform(k1, (embed_dim, inner_dim), dtype, -lim1, lim1)
    b1 = jax.random.uniform(k2, (inner_dim,), dtype, -lim1, lim1)
    w2 = jax.random.uniform(k3, (inner_dim, embed_dim), dtype, -lim2, lim2)
    b2 = jax.random.uniform(k4, (embed_dim,), dtype, -lim2, lim2)
    return w1, b1, w2, b2


if __name__ == "__main__":
    key = jax.random.PRNGKey(0)
    k_x, k_p = jax.random.split(key)

    # Small correctness-only config (not representative for benchmarking:
    # D=32 < 128 lanes exercises masked stores).
    batch, seq, embed_dim = 2, 8, 32
    inner_dim = 4 * embed_dim  # config.intermediate_size default = 4 * hidden_size

    hidden_states = jax.random.normal(k_x, (batch, seq, embed_dim), jnp.float32)
    w1, b1, w2, b2 = init_mlp_params(k_p, embed_dim, inner_dim)

    # f32 path (in-place accumulation, no scratch).
    out = jax.block_until_ready(mlp_forward(hidden_states, w1, b1, w2, b2))
    ref = _gelu_exact(hidden_states @ w1 + b1) @ w2 + b2
    assert out.shape == hidden_states.shape
    assert jnp.allclose(out, ref, atol=1e-5, rtol=1e-5), float(jnp.max(jnp.abs(out - ref)))

    # Non-128-divisible intermediate size -> exercises the I zero-padding path.
    inner_dim2 = 96
    w1b, b1b, w2b, b2b = init_mlp_params(jax.random.PRNGKey(1), embed_dim, inner_dim2)
    out2 = jax.block_until_ready(mlp_forward(hidden_states, w1b, b1b, w2b, b2b))
    ref2 = _gelu_exact(hidden_states @ w1b + b1b) @ w2b + b2b
    assert jnp.allclose(out2, ref2, atol=1e-5, rtol=1e-5), float(jnp.max(jnp.abs(out2 - ref2)))

    # bf16 path -> exercises the f32-scratch accumulator variant.
    hs_bf16 = hidden_states.astype(jnp.bfloat16)
    w1c, b1c, w2c, b2c = (a.astype(jnp.bfloat16) for a in (w1, b1, w2, b2))
    out3 = jax.block_until_ready(mlp_forward(hs_bf16, w1c, b1c, w2c, b2c))
    f32 = jnp.float32
    ref3 = (_gelu_exact(hs_bf16.astype(f32) @ w1c.astype(f32) + b1c.astype(f32))
            @ w2c.astype(f32) + b2c.astype(f32))
    assert out3.dtype == jnp.bfloat16 and out3.shape == hidden_states.shape
    assert jnp.allclose(out3.astype(f32), ref3, atol=5e-2, rtol=5e-2), \
        float(jnp.max(jnp.abs(out3.astype(f32) - ref3)))

    print("KERNEL_OK")
</pallas_src>

<mosaic_0001>
module attributes {stable_mosaic.version = 11 : i64} {
  func.func @mlp_kernel_inplace(%arg0: i32, %arg1: i32, %arg2: memref<16x32xf32, #tpu.memory_space<vmem>>, %arg3: memref<32x128xf32, #tpu.memory_space<vmem>>, %arg4: memref<1x128xf32, #tpu.memory_space<vmem>>, %arg5: memref<128x32xf32, #tpu.memory_space<vmem>>, %arg6: memref<1x32xf32, #tpu.memory_space<vmem>>, %arg7: memref<16x32xf32, #tpu.memory_space<vmem>>) attributes {dimension_semantics = [#tpu.dimension_semantics<parallel>, #tpu.dimension_semantics<arbitrary>], iteration_bounds = array<i64: 1, 1>, scalar_prefetch = 0 : i64, scratch_operands = 0 : i64, tpu.core_type = #tpu.core_type<tc>, window_params = [{pipeline_mode = #tpu.pipeline_mode<synchronous>, transform_indices = @transform_0, window_bounds = array<i64: 16, 32>}, {transform_indices = @transform_1, window_bounds = array<i64: 32, 128>}, {transform_indices = @transform_2, window_bounds = array<i64: 1, 128>}, {transform_indices = @transform_3, window_bounds = array<i64: 128, 32>}, {pipeline_mode = #tpu.pipeline_mode<synchronous>, transform_indices = @transform_4, window_bounds = array<i64: 1, 32>}, {transform_indices = @transform_5, window_bounds = array<i64: 16, 32>}]} {
    %c0 = arith.constant 0 : index
    %c0_0 = arith.constant 0 : index
    %0 = vector.load %arg2[%c0, %c0_0] : memref<16x32xf32, #tpu.memory_space<vmem>>, vector<16x32xf32>
    %c0_1 = arith.constant 0 : index
    %c0_2 = arith.constant 0 : index
    %1 = vector.load %arg3[%c0_1, %c0_2] : memref<32x128xf32, #tpu.memory_space<vmem>>, vector<32x128xf32>
    %cst = arith.constant dense<0.000000e+00> : vector<16x128xf32>
    %2 = tpu.matmul %0, %1, %cst {dimension_numbers = #tpu.dot_dimension_numbers<[1], [0], [0], [1], [0, 0, 1, 1], [], []>} : vector<16x32xf32>, vector<32x128xf32>, vector<16x128xf32> -> vector<16x128xf32>
    %c0_3 = arith.constant 0 : index
    %c0_4 = arith.constant 0 : index
    %3 = vector.load %arg4[%c0_3, %c0_4] : memref<1x128xf32, #tpu.memory_space<vmem>>, vector<1x128xf32>
    %4 = vector.broadcast %3 : vector<1x128xf32> to vector<16x128xf32>
    %5 = arith.addf %2, %4 : vector<16x128xf32>
    %cst_5 = arith.constant 5.000000e-01 : f32
    %6 = vector.broadcast %cst_5 : f32 to vector<16x128xf32>
    %7 = arith.mulf %6, %5 : vector<16x128xf32>
    %cst_6 = arith.constant 0.707106769 : f32
    %8 = vector.broadcast %cst_6 : f32 to vector<16x128xf32>
    %9 = arith.mulf %5, %8 : vector<16x128xf32>
    %10 = math.erf %9 : vector<16x128xf32>
    %cst_7 = arith.constant 1.000000e+00 : f32
    %11 = vector.broadcast %cst_7 : f32 to vector<16x128xf32>
    %12 = arith.addf %11, %10 : vector<16x128xf32>
    %13 = arith.mulf %7, %12 : vector<16x128xf32>
    %c0_8 = arith.constant 0 : index
    %c0_9 = arith.constant 0 : index
    %14 = vector.load %arg5[%c0_8, %c0_9] : memref<128x32xf32, #tpu.memory_space<vmem>>, vector<128x32xf32>
    %cst_10 = arith.constant dense<0.000000e+00> : vector<16x32xf32>
    %15 = tpu.matmul %13, %14, %cst_10 {dimension_numbers = #tpu.dot_dimension_numbers<[1], [0], [0], [1], [0, 0, 1, 1], [], []>} : vector<16x128xf32>, vector<128x32xf32>, vector<16x32xf32> -> vector<16x32xf32>
    %c0_i32 = arith.constant 0 : i32
    %16 = arith.cmpi eq, %arg1, %c0_i32 : i32
    %17 = arith.extui %16 : i1 to i32
    %c0_i32_11 = arith.constant 0 : i32
    %18 = arith.cmpi ne, %17, %c0_i32_11 : i32
    scf.if %18 {
      %c0_16 = arith.constant 0 : index
      %c0_17 = arith.constant 0 : index
      %25 = vector.load %arg7[%c0_16, %c0_17] : memref<16x32xf32, #tpu.memory_space<vmem>>, vector<16x32xf32>
      tpu.vector_store %arg7[%c0_16, %c0_17], %15 {strides = array<i32>} : memref<16x32xf32, #tpu.memory_space<vmem>>, vector<16x32xf32>,
    } else {
    }
    %c0_i32_12 = arith.constant 0 : i32
    %19 = arith.cmpi ne, %arg1, %c0_i32_12 : i32
    %20 = arith.extui %19 : i1 to i32
    %c0_i32_13 = arith.constant 0 : i32
    %21 = arith.cmpi ne, %20, %c0_i32_13 : i32
    scf.if %21 {
      %c0_16 = arith.constant 0 : index
      %c0_17 = arith.constant 0 : index
      %25 = vector.load %arg7[%c0_16, %c0_17] : memref<16x32xf32, #tpu.memory_space<vmem>>, vector<16x32xf32>
      %26 = arith.addf %25, %15 : vector<16x32xf32>
      %c0_18 = arith.constant 0 : index
      %c0_19 = arith.constant 0 : index
      %27 = vector.load %arg7[%c0_18, %c0_19] : memref<16x32xf32, #tpu.memory_space<vmem>>, vector<16x32xf32>
      tpu.vector_store %arg7[%c0_18, %c0_19], %26 {strides = array<i32>} : memref<16x32xf32, #tpu.memory_space<vmem>>, vector<16x32xf32>,
    } else {
    }
    %c0_i32_14 = arith.constant 0 : i32
    %22 = arith.cmpi eq, %arg1, %c0_i32_14 : i32
    %23 = arith.extui %22 : i1 to i32
    %c0_i32_15 = arith.constant 0 : i32
    %24 = arith.cmpi ne, %23, %c0_i32_15 : i32
    scf.if %24 {
      %c0_16 = arith.constant 0 : index
      %c0_17 = arith.constant 0 : index
      %25 = vector.load %arg7[%c0_16, %c0_17] : memref<16x32xf32, #tpu.memory_space<vmem>>, vector<16x32xf32>
      %c0_18 = arith.constant 0 : index
      %c0_19 = arith.constant 0 : index
      %26 = vector.load %arg6[%c0_18, %c0_19] : memref<1x32xf32, #tpu.memory_space<vmem>>, vector<1x32xf32>
      %27 = vector.broadcast %26 : vector<1x32xf32> to vector<16x32xf32>
      %28 = arith.addf %25, %27 : vector<16x32xf32>
      %c0_20 = arith.constant 0 : index
      %c0_21 = arith.constant 0 : index
      %29 = vector.load %arg7[%c0_20, %c0_21] : memref<16x32xf32, #tpu.memory_space<vmem>>, vector<16x32xf32>
      tpu.vector_store %arg7[%c0_20, %c0_21], %28 {strides = array<i32>} : memref<16x32xf32, #tpu.memory_space<vmem>>, vector<16x32xf32>,
    } else {
    }
    return
  }
  func.func @transform_0(%arg0: i32, %arg1: i32) -> (i32, i32) {
    %c0_i32 = arith.constant 0 : i32
    %c0_i32_0 = arith.constant 0 : i32
    return %arg0, %c0_i32 : i32, i32
  }
  func.func @transform_1(%arg0: i32, %arg1: i32) -> (i32, i32) {
    %c0_i32 = arith.constant 0 : i32
    %c0_i32_0 = arith.constant 0 : i32
    return %c0_i32, %arg1 : i32, i32
  }
  func.func @transform_2(%arg0: i32, %arg1: i32) -> (i32, i32) {
    %c0_i32 = arith.constant 0 : i32
    %c0_i32_0 = arith.constant 0 : i32
    return %c0_i32, %arg1 : i32, i32
  }
  func.func @transform_3(%arg0: i32, %arg1: i32) -> (i32, i32) {
    %c0_i32 = arith.constant 0 : i32
    %c0_i32_0 = arith.constant 0 : i32
    return %arg1, %c0_i32 : i32, i32
  }
  func.func @transform_4(%arg0: i32, %arg1: i32) -> (i32, i32) {
    %c0_i32 = arith.constant 0 : i32
    %c0_i32_0 = arith.constant 0 : i32
    %c0_i32_1 = arith.constant 0 : i32
    return %c0_i32, %c0_i32_0 : i32, i32
  }
  func.func @transform_5(%arg0: i32, %arg1: i32) -> (i32, i32) {
    %c0_i32 = arith.constant 0 : i32
    %c0_i32_0 = arith.constant 0 : i32
    return %arg0, %c0_i32 : i32, i32
  }
}

</mosaic_0001>

<bundles_post_ra>
// kernel: mlp_forward.1
= control target key start
LH: loop header
LB: loop body
LE: loop exit
PB: predicated region body
PF: predicated region fallthrough
CT: control target
= control target key end

     0   :  { %vm34_vm0 = vcmask 261120   ;;  %s533_s0 = inlined_call_operand.vmem [shape: f32[16,32], index: 0, kind: input, shape index: {}]   ;;  %s534_s1 = inlined_call_operand.vmem [shape: f32[32,128], index: 1, kind: input, shape index: {}]   ;;  %s535_s2 = inlined_call_operand.vmem [shape: f32[1,128], index: 2, kind: input, shape index: {}]   ;;  %s536_s3 = inlined_call_operand.vmem [shape: f32[128,32], index: 3, kind: input, shape index: {}]   ;;  %s537_s4 = inlined_call_operand.vmem [shape: f32[1,32], index: 4, kind: input, shape index: {}]   ;;  %s538_s5 = inlined_call_operand.hbm [shape: f32[16,32], index: 5, kind: output, shape index: {}]  }
   0x1   :  { %v23_v0 = vld [vmem:[%s534_s1] sm:$0xff]  ;;  %v24_v1 = vld [vmem:[%s534_s1 + $0x8] sm:$0xff]  ;;  %v25_v2 = vld [vmem:[%s534_s1 + $0x10] sm:$0xff] }
   0x2   :  { %v339_v3 = vpack.c.bf16 %v24_v1, %v23_v0  ;;  %v26_v4 = vld [vmem:[%s534_s1 + $0x18] sm:$0xff]  ;;  %v21_v5 = vld [vmem:[%s533_s0] sm:$0xff]  ;;  %v127_v8 = vld [vmem:[%s536_s3 + $0x8] sm:$0xff] }
   0x3   :  { %v343_v6 = vpack.c.bf16 %v26_v4, %v25_v2  ;;  %301 = vmatprep.mubr.msk.f32.mxu0 %vm34_vm0, %v21_v5  ;;  %v126_v7 = vld [vmem:[%s536_s3] sm:$0xff]  ;;  %v128_v9 = vld [vmem:[%s536_s3 + $0x10] sm:$0xff]  ;;  %v129_v11 = vld [vmem:[%s536_s3 + $0x18] sm:$0xff] }
   0x4   :  { %340 = vmatprep.subr.bf16.mxu0 %v339_v3  ;;  %v347_v10 = vpack.c.bf16 %v127_v8, %v126_v7  ;;  %v351_v12 = vpack.c.bf16 %v129_v11, %v128_v9  ;;  %v130_v13 = vld [vmem:[%s536_s3 + $0x20] sm:$0xff]  ;;  %v131_v14 = vld [vmem:[%s536_s3 + $0x28] sm:$0xff] }
   0x5   :  { %342 = vmatpush3.bf16.msra.mxu0 %v339_v3 }
   0x6   :  { %10 = vsyncpa [#allocation3], 0  ;;  %344 = vmatprep.subr.bf16.mxu0 %v343_v6  ;;  %348 = vmatprep.subr.bf16.mxu1 %v347_v10  ;;  %v355_v15 = vpack.c.bf16 %v131_v14, %v130_v13  ;;  %v22_v16 = vld [vmem:[%s533_s0 + $0x8] sm:$0xff]  ;;  %v132_v17 = vld [vmem:[%s536_s3 + $0x30] sm:$0xff]  ;;  %s410_s11 = smov [#allocation2]  }
   0x7   :  { %350 = vmatpush3.bf16.msra.mxu1 %v347_v10  ;;  %v133_v18 = vld [vmem:[%s536_s3 + $0x38] sm:$0xff]  ;;  %v134_v20 = vld [vmem:[%s536_s3 + $0x40] sm:$0xff]  ;;  %v135_v21 = vld [vmem:[%s536_s3 + $0x48] sm:$0xff]  ;;  %s254_s12 = sshll.u32 %s410_s11, 4  ;;  %s255_s12 = int_to_ptr.vmem [resolvable:$true] %s254_s12 }
   0x8   :  { %352 = vmatprep.subr.bf16.mxu1 %v351_v12  ;;  %v359_v19 = vpack.c.bf16 %v133_v18, %v132_v17  ;;  %v363_v22 = vpack.c.bf16 %v135_v21, %v134_v20  ;;  %v136_v23 = vld [vmem:[%s536_s3 + $0x50] sm:$0xff]  ;;  %v137_v24 = vld [vmem:[%s536_s3 + $0x58] sm:$0xff]  ;;  %v138_v26 = vld [vmem:[%s536_s3 + $0x60] sm:$0xff]  ;;  %s386_s13 = scalar_lea.vmem %s255_s12, 256  ;;  %p391_p1 = scmp.lt.s32.totalorder %s255_s12, %s255_s12 }
   0x9   :  { %346 = vmatpush3.bf16.msra.mxu0 %v343_v6  ;;  %v367_v25 = vpack.c.bf16 %v137_v24, %v136_v23  ;;  %v139_v27 = vld [vmem:[%s536_s3 + $0x68] sm:$0xff]  ;;  %v140_v29 = vld [vmem:[%s536_s3 + $0x70] sm:$0xff]  ;;  %v141_v30 = vld [vmem:[%s536_s3 + $0x78] sm:$0xff]  ;;  %p387_p0 = scmp.ne.s32.totalorder %s255_s12, %s386_s13  ;;  %p392_p2 = scmp.lt.s32.totalorder %s386_s13, %s386_s13 }
   0xa   :  { %v371_v28 = vpack.c.bf16 %v139_v27, %v138_v26  ;;  %v375_v31 = vpack.c.bf16 %v141_v30, %v140_v29  ;;  %v265_v32 = vld [vmem:[%s535_s2] ss:$0 sm:$0xff] }
   0xb   :  { %354 = vmatpush3.bf16.msra.mxu1 %v351_v12  ;;  %v268_v49 = vld [vmem:[%s537_s4] ss:$0 sm:$0xff]  ;;  %p393_p3 = por %p392_p2, %p391_p1 }
   0xc   :  { %302 = vmatmul.mubr.msk.f32.vlgmr.msra.gmra.mrb[0].mxu0 %vm34_vm0, %v22_v16  ;;  %356 = vmatprep.subr.bf16.mxu1 %v355_v15 }
   0xd   :  { %p394_p4 = pnand %p393_p3, %p387_p0 }
   0xf   :  { %358 = vmatpush3.bf16.msra.mxu1 %v355_v15 }
  0x10   :  { %360 = vmatprep.subr.bf16.mxu1 %v359_v19 }
  0x13   :  { %362 = vmatpush3.bf16.msra.mxu1 %v359_v19 }
  0x14   :  { %364 = vmatprep.subr.bf16.mxu1 %v363_v22 }
  0x17   :  { %366 = vmatpush3.bf16.msra.mxu1 %v363_v22 }
  0x18   :  { %368 = vmatprep.subr.bf16.mxu1 %v367_v25 }
  0x1b   :  { %370 = vmatpush3.bf16.msra.mxu1 %v367_v25 }
  0x1c   :  { %372 = vmatprep.subr.bf16.mxu1 %v371_v28 }
  0x1f   :  { %374 = vmatpush3.bf16.msra.mxu1 %v371_v28 }
  0x20   :  { %376 = vmatprep.subr.bf16.mxu1 %v375_v31 }
  0x23   :  { %378 = vmatpush3.bf16.msra.mxu1 %v375_v31 }
  0xdf   :  { %v303_v33 = vpop.f32.mrb[0].mxu0 }
  0xe0   :  { %v113_v34 = vadd.f32 %v303_v33, %v265_v32  ;;  %v107_v35 = vpop.f32.mrb[1].mxu0 }
  0xe1   :  { %v108_v36 = vadd.f32 %v265_v32, %v107_v35 }
  0xe2   :  { %v119_v37 = vmul.f32 0.70710677, %v113_v34  ;;  %v117_v44 = vmul.f32 0.5, %v113_v34 }
  0xe3   :  { %v118_v38 = vmul.f32 0.70710677, %v108_v36  ;;  %v116_v42 = vmul.f32 0.5, %v108_v36 }
  0xe4   :  { %382 = verf.f32 %v119_v37 }
  0xe5   :  { %384 = verf.f32 %v118_v38 }
  0xee   :  { %v383_v39 = vpop.eup %382 }
  0xef   :  { %v385_v40 = vpop.eup %384  ;;  %v123_v41 = vadd.f32 1.0, %v383_v39 }
  0xf0   :  { %v122_v43 = vadd.f32 1.0, %v385_v40 }
  0xf1   :  { %v125_v46 = vmul.f32 %v123_v41, %v117_v44 }
  0xf2   :  { %v124_v45 = vmul.f32 %v122_v43, %v116_v42 }
  0xf4   :  { %336 = vmatprep.mubr.f32.mxu1 %v124_v45 }
  0xf5   :  { %337 = vmatmul.mubr.f32.vlgmr.msra.gmra.mrb[0].mxu1 %v125_v46 }
 0x1c8   :  { %v338_v47 = vpop.f32.mrb[0].mxu1 }
 0x1c9   :  { %222 = vst.msk [vmem:[#allocation2 + $0x8] sm:$0xff] %vm34_vm0, %v338_v47  ;;  %v208_v48 = vpop.f32.mrb[1].mxu1 }
 0x1ca   :  { %221 = vst.msk [vmem:[#allocation2] sm:$0xff] %vm34_vm0, %v208_v48 }
 0x1d0   :  { %v237_v50 = vld [vmem:[#allocation2 + $0x8] sm:$0xff] }
 0x1d1   :  { %v246_v51 = vadd.f32 %v268_v49, %v237_v50  ;;  %v236_v52 = vld [vmem:[#allocation2] sm:$0xff] }
 0x1d2   :  { %v245_v53 = vadd.f32 %v268_v49, %v236_v52 }
 0x1d3   :  { %248 = vst.msk [vmem:[#allocation2 + $0x8] sm:$0xff] %vm34_vm0, %v246_v51 }
 0x1d4   :  { %247 = vst.msk [vmem:[#allocation2] sm:$0xff] %vm34_vm0, %v245_v53 }
 0x1d5   :  { %397 = shalt.err (!%p394_p4)
}
 0x1d6   :  { %s398_s15 = scalar_lea.hbm %s538_s5, 256 }
 0x1d7   :  { %p399_p5 = scmp.ne.s32.totalorder %s538_s5, %s398_s15  ;;  %p402_p6 = scmp.lt.u32.totalorder %s398_s15, %s538_s5 }
 0x1d9   :  { %p404_p7 = pnand %p402_p6, %p399_p5 }
 0x1db   :  { %407 = shalt.err (!%p404_p7)
}
 0x1dc   :  { %s411_s20 = smov 128   ;;  %s412_s21 = smov 8  }
 0x1dd   :  { %260 = dma.vmem_to_hbm [thread:$0]  %s255_s12, 256, %s538_s5, [#allocation3], %s411_s20, %s411_s20, %s412_s21  }
 0x1de   :  { %408 = dma.done.wait [#allocation3], 256  }
 0x1df   :  { %409 = vsyncadd [#allocation3], 4294967040 }
 0x1e0   :  { %264 = vsyncpa [#allocation3], 1 }

</bundles_post_ra>
